<compile_context>
chip_gen: v7x
topology: tpu7x:2x2x1
jax: 0.10.0
libtpu: 0.0.40
codegen_flags: <defaults>
</compile_context>

<pallas_src>
import functools

import jax
import jax.numpy as jnp
from jax.experimental import pallas as pl
from jax.experimental.pallas import tpu as pltpu


# ---------------------------------------------------------------------------
# Fused single-pass kernel: pool + fc + gate in one sweep over x.
# ---------------------------------------------------------------------------
def _tatt_fused_kernel(x_ref, w1_ref, w2_ref, o_ref):
    # x_ref / o_ref: (bt, C, HW) in the input dtype.
    # w1_ref: (C, Cr) float32, pre-scaled by 1/HW.  w2_ref: (Cr, C) float32.
    x = x_ref[...]

    # Global average pool as an f32-accumulated spatial sum (1/HW folded in w1).
    y = jnp.sum(x, axis=-1, dtype=jnp.float32)                           # (bt, C)

    # fc: Linear(C, Cr) -> ReLU -> Linear(Cr, C) -> Sigmoid (tiny MXU matmuls).
    h = jnp.maximum(
        jnp.dot(y, w1_ref[...], preferred_element_type=jnp.float32), 0.0)   # (bt, Cr)
    s = jax.nn.sigmoid(
        jnp.dot(h, w2_ref[...], preferred_element_type=jnp.float32))        # (bt, C)

    # Channel gate broadcast over spatial; multiply in the input dtype so no
    # full f32 slab of x is ever materialized.
    o_ref[...] = x * s.astype(x.dtype)[:, :, None]


# ---------------------------------------------------------------------------
# Two-pass fallback kernels (batch elements too large for a single VMEM block).
# ---------------------------------------------------------------------------
def _pool_kernel(x_ref, o_ref, *, hw_tile, hw_total):
    # x_ref: (1, C, hw_tile); o_ref: (1, 1, C) f32, resident across the HW axis.
    s = pl.program_id(1)

    @pl.when(s == 0)
    def _():
        o_ref[...] = jnp.zeros_like(o_ref)

    x = x_ref[...]
    if hw_total % hw_tile != 0:
        # Mask the out-of-range tail of the (padded) last spatial tile.
        lane = jax.lax.broadcasted_iota(jnp.int32, x.shape, 2) + s * hw_tile
        x = jnp.where(lane < hw_total, x, jnp.zeros_like(x))
    o_ref[...] += jnp.sum(x, axis=-1, dtype=jnp.float32)[:, None, :]


def _apply_kernel(x_ref, g_ref, o_ref):
    # x_ref / o_ref: (1, C, hw_tile); g_ref: (1, C, 1) f32 channel gate.
    x = x_ref[...]
    o_ref[...] = x * g_ref[...].astype(x.dtype)


# ---------------------------------------------------------------------------
# Wrapper
# ---------------------------------------------------------------------------
def _round_down(x, m):
    return (x // m) * m


def _vmem_budget():
    """Generation-aware (target x-block bytes, scoped-VMEM limit bytes)."""
    try:
        vmem_phys = int(pltpu.get_tpu_info().vmem_capacity_bytes)
    except Exception:
        vmem_phys = 64 * 1024 * 1024                 # conservative (v7x-like)
    if vmem_phys >= 96 * 1024 * 1024:                # v5e / v6e: 128 MiB VMEM
        return 12 * 1024 * 1024, 96 * 1024 * 1024
    return 6 * 1024 * 1024, 32 * 1024 * 1024         # v7x: 64 MiB VMEM per TC


def _tattention_two_pass(x, w1_scaled, w2_f32, B, C, Cr, HW, itemsize,
                         target_block_bytes, vmem_limit, donate_x):
    # Lane-aligned spatial tile sized from the byte budget.
    hw_budget = max(1, target_block_bytes // (C * itemsize))
    hw_tile = max(128, _round_down(min(hw_budget, HW), 128))
    n_hw = pl.cdiv(HW, hw_tile)

    # Pass 1: f32 spatial sums per (batch, channel), tiled over HW.
    pool = pl.pallas_call(
        functools.partial(_pool_kernel, hw_tile=hw_tile, hw_total=HW),
        out_shape=jax.ShapeDtypeStruct((B, 1, C), jnp.float32),
        grid_spec=pltpu.PrefetchScalarGridSpec(
            num_scalar_prefetch=0,
            grid=(B, n_hw),
            in_specs=[pl.BlockSpec((1, C, hw_tile), lambda b, s: (b, 0, s))],
            out_specs=pl.BlockSpec((1, 1, C), lambda b, s: (b, 0, 0)),
        ),
        compiler_params=pltpu.CompilerParams(
            dimension_semantics=("parallel", "arbitrary"),
            vmem_limit_bytes=vmem_limit,
        ),
        cost_estimate=pl.CostEstimate(
            flops=int(B * C * HW),
            transcendentals=0,
            bytes_accessed=int(B * C * HW * itemsize + B * C * 4),
        ),
    )(x)

    # Pass 2 (tiny, plain JAX): fc on the pooled sums -> channel gate.
    y = pool.reshape(B, C)                                    # f32 spatial sums
    h = jnp.maximum(jnp.dot(y, w1_scaled), 0.0)               # 1/HW folded in w1
    gate = jax.nn.sigmoid(jnp.dot(h, w2_f32)).reshape(B, C, 1)

    # Pass 3: apply the gate, tiled over HW.
    return pl.pallas_call(
        _apply_kernel,
        out_shape=jax.ShapeDtypeStruct((B, C, HW), x.dtype),
        grid_spec=pltpu.PrefetchScalarGridSpec(
            num_scalar_prefetch=0,
            grid=(B, n_hw),
            in_specs=[
                pl.BlockSpec((1, C, hw_tile), lambda b, s: (b, 0, s)),
                pl.BlockSpec((1, C, 1), lambda b, s: (b, 0, 0)),
            ],
            out_specs=pl.BlockSpec((1, C, hw_tile), lambda b, s: (b, 0, s)),
        ),
        compiler_params=pltpu.CompilerParams(
            dimension_semantics=("parallel", "parallel"),
            vmem_limit_bytes=vmem_limit,
        ),
        cost_estimate=pl.CostEstimate(
            flops=int(B * C * HW),
            transcendentals=0,
            bytes_accessed=int(2 * B * C * HW * itemsize + B * C * 4),
        ),
        input_output_aliases=({0: 0} if donate_x else {}),
    )(x, gate)


def tattention(x_nchw, w1, w2, *, force_two_pass=False, donate_x=False):
    """TAttention forward.

    x_nchw: (B, C, H, W).  w1: (C, C//r) = Linear1.weight.T;
    w2: (C//r, C) = Linear2.weight.T (bias-free, per the module).
    Returns (B, C, H, W) in x's dtype.
    """
    B, C, H, W = x_nchw.shape
    HW = H * W
    Cr = w1.shape[1]
    itemsize = jnp.dtype(x_nchw.dtype).itemsize

    x = x_nchw.reshape(B, C, HW)

    # Fold the mean's 1/HW into w1; pre-cast weights to f32 once in the wrapper.
    w1_scaled = w1.astype(jnp.float32) * (1.0 / float(HW))
    w2_f32 = w2.astype(jnp.float32)

    target_block_bytes, vmem_limit = _vmem_budget()
    per_batch_bytes = C * HW * itemsize
    weights_vmem = 2 * (C * Cr + Cr * C) * 4       # double-buffered f32 weights
    # Single-pass need: (in + out) x-blocks, each double-buffered, + weights + slack.
    fits_single_pass = (4 * per_batch_bytes + weights_vmem + (1 << 20)) <= vmem_limit

    if force_two_pass or not fits_single_pass:
        out = _tattention_two_pass(x, w1_scaled, w2_f32, B, C, Cr, HW, itemsize,
                                   target_block_bytes, vmem_limit, donate_x)
        return out.reshape(B, C, H, W)

    # --- fused single pass --------------------------------------------------
    # Batch tile from the byte budget (no divisibility requirement); cap at B//4
    # so each TensorCore of a megacore part gets >= 2 grid steps when B allows.
    bt_cap = max(1, B // 4) if B >= 4 else 1
    bt = int(max(1, min(target_block_bytes // per_batch_bytes, bt_cap)))
    grid = (pl.cdiv(B, bt),)

    cost = pl.CostEstimate(
        flops=int(2 * B * C * HW + 4 * B * C * Cr),
        transcendentals=int(B * C),
        bytes_accessed=int(2 * B * C * HW * itemsize + 2 * C * Cr * 4),
    )

    out = pl.pallas_call(
        _tatt_fused_kernel,
        out_shape=jax.ShapeDtypeStruct((B, C, HW), x.dtype),
        grid_spec=pltpu.PrefetchScalarGridSpec(
            num_scalar_prefetch=0,
            grid=grid,
            in_specs=[
                pl.BlockSpec((bt, C, HW), lambda i: (i, 0, 0)),
                pl.BlockSpec((C, Cr), lambda i: (0, 0)),
                pl.BlockSpec((Cr, C), lambda i: (0, 0)),
            ],
            out_specs=pl.BlockSpec((bt, C, HW), lambda i: (i, 0, 0)),
        ),
        compiler_params=pltpu.CompilerParams(
            dimension_semantics=("parallel",),
            vmem_limit_bytes=vmem_limit,
        ),
        cost_estimate=cost,
        input_output_aliases=({0: 0} if donate_x else {}),
    )(x, w1_scaled, w2_f32)

    return out.reshape(B, C, H, W)


# ---------------------------------------------------------------------------
# Reference + tests
# ---------------------------------------------------------------------------
def _reference(x_nchw, w1, w2):
    xf = x_nchw.astype(jnp.float32)
    y = jnp.mean(xf, axis=(2, 3))                              # (B, C)
    h = jnp.maximum(y @ w1.astype(jnp.float32), 0.0)           # (B, Cr)
    s = jax.nn.sigmoid(h @ w2.astype(jnp.float32))             # (B, C)
    return (xf * s[:, :, None, None]).astype(x_nchw.dtype)


if __name__ == "__main__":
    key = jax.random.PRNGKey(0)

    def _make(B, C, Cr, H, W, dtype):
        kx, k1, k2 = jax.random.split(jax.random.fold_in(key, B * 1000 + H), 3)
        x = jax.random.normal(kx, (B, C, H, W), dtype=jnp.float32).astype(dtype)
        # std=0.001 matches init_weights' Linear init.
        w1 = 0.001 * jax.random.normal(k1, (C, Cr), dtype=jnp.float32)
        w2 = 0.001 * jax.random.normal(k2, (Cr, C), dtype=jnp.float32)
        return x, w1, w2

    # 1) Baseline: lane-aligned spatial (HW=256), fused single-pass path.
    x, w1, w2 = _make(2, 32, 8, 16, 16, jnp.float32)
    out = jax.block_until_ready(tattention(x, w1, w2))
    assert out.shape == x.shape
    assert jnp.allclose(out, _reference(x, w1, w2), atol=1e-5, rtol=1e-5)

    # 2) Unaligned spatial (HW=144) + ragged batch grid (B=11, bt=2 -> 6 steps).
    x, w1, w2 = _make(11, 32, 8, 12, 12, jnp.float32)
    out = jax.block_until_ready(tattention(x, w1, w2))
    assert jnp.allclose(out, _reference(x, w1, w2), atol=1e-5, rtol=1e-5)

    # 3) Two-pass fallback path (pool kernel -> JAX fc -> gate-apply kernel).
    x, w1, w2 = _make(2, 32, 8, 12, 12, jnp.float32)
    out = jax.block_until_ready(tattention(x, w1, w2, force_two_pass=True))
    assert jnp.allclose(out, _reference(x, w1, w2), atol=1e-5, rtol=1e-5)

    # 4) bf16 input: gate multiply runs in bf16 inside the kernel (~1 ulp diff).
    x, w1, w2 = _make(2, 32, 8, 16, 16, jnp.bfloat16)
    out = jax.block_until_ready(tattention(x, w1, w2))
    ref = _reference(x, w1, w2).astype(jnp.float32)
    assert jnp.allclose(out.astype(jnp.float32), ref, atol=5e-2, rtol=5e-2)

    print("KERNEL_OK")
</pallas_src>

<mosaic_0001>
module attributes {stable_mosaic.version = 11 : i64} {
  func.func @_tatt_fused_kernel(%arg0: i32, %arg1: memref<1x32x256xf32, #tpu.memory_space<vmem>>, %arg2: memref<32x8xf32, #tpu.memory_space<vmem>>, %arg3: memref<8x32xf32, #tpu.memory_space<vmem>>, %arg4: memref<1x32x256xf32, #tpu.memory_space<vmem>>) attributes {dimension_semantics = [#tpu.dimension_semantics<parallel>], iteration_bounds = array<i64: 2>, scalar_prefetch = 0 : i64, scratch_operands = 0 : i64, tpu.core_type = #tpu.core_type<tc>, window_params = [{transform_indices = @transform_0, window_bounds = array<i64: 1, 32, 256>}, {pipeline_mode = #tpu.pipeline_mode<synchronous>, transform_indices = @transform_1, window_bounds = array<i64: 32, 8>}, {pipeline_mode = #tpu.pipeline_mode<synchronous>, transform_indices = @transform_2, window_bounds = array<i64: 8, 32>}, {transform_indices = @transform_3, window_bounds = array<i64: 1, 32, 256>}]} {
    %c0 = arith.constant 0 : index
    %c0_0 = arith.constant 0 : index
    %c0_1 = arith.constant 0 : index
    %0 = vector.load %arg1[%c0, %c0_0, %c0_1] : memref<1x32x256xf32, #tpu.memory_space<vmem>>, vector<1x32x256xf32>
    %cst = arith.constant dense<0.000000e+00> : vector<1x32xf32>
    %1 = vector.multi_reduction <add>, %0, %cst [2] : vector<1x32x256xf32> to vector<1x32xf32>
    %c0_2 = arith.constant 0 : index
    %c0_3 = arith.constant 0 : index
    %2 = vector.load %arg2[%c0_2, %c0_3] : memref<32x8xf32, #tpu.memory_space<vmem>>, vector<32x8xf32>
    %cst_4 = arith.constant dense<0.000000e+00> : vector<1x8xf32>
    %3 = tpu.matmul %1, %2, %cst_4 {dimension_numbers = #tpu.dot_dimension_numbers<[1], [0], [0], [1], [0, 0, 1, 1], [], []>} : vector<1x32xf32>, vector<32x8xf32>, vector<1x8xf32> -> vector<1x8xf32>
    %cst_5 = arith.constant 0.000000e+00 : f32
    %4 = vector.broadcast %cst_5 : f32 to vector<1x8xf32>
    %5 = arith.maximumf %3, %4 : vector<1x8xf32>
    %c0_6 = arith.constant 0 : index
    %c0_7 = arith.constant 0 : index
    %6 = vector.load %arg3[%c0_6, %c0_7] : memref<8x32xf32, #tpu.memory_space<vmem>>, vector<8x32xf32>
    %cst_8 = arith.constant dense<0.000000e+00> : vector<1x32xf32>
    %7 = tpu.matmul %5, %6, %cst_8 {dimension_numbers = #tpu.dot_dimension_numbers<[1], [0], [0], [1], [0, 0, 1, 1], [], []>} : vector<1x8xf32>, vector<8x32xf32>, vector<1x32xf32> -> vector<1x32xf32>
    %8 = arith.negf %7 : vector<1x32xf32>
    %9 = math.exp %8 : vector<1x32xf32>
    %cst_9 = arith.constant 1.000000e+00 : f32
    %10 = vector.broadcast %cst_9 : f32 to vector<1x32xf32>
    %11 = arith.addf %10, %9 : vector<1x32xf32>
    %12 = arith.divf %10, %11 : vector<1x32xf32>
    %13 = vector.shape_cast %12 : vector<1x32xf32> to vector<1x32x1xf32>
    %14 = vector.broadcast %13 : vector<1x32x1xf32> to vector<1x32x256xf32>
    %15 = arith.mulf %0, %14 : vector<1x32x256xf32>
    %c0_10 = arith.constant 0 : index
    %c0_11 = arith.constant 0 : index
    %c0_12 = arith.constant 0 : index
    %16 = vector.load %arg4[%c0_10, %c0_11, %c0_12] : memref<1x32x256xf32, #tpu.memory_space<vmem>>, vector<1x32x256xf32>
    tpu.vector_store %arg4[%c0_10, %c0_11, %c0_12], %15 {strides = array<i32>} : memref<1x32x256xf32, #tpu.memory_space<vmem>>, vector<1x32x256xf32>,
    return
  }
  func.func @transform_0(%arg0: i32) -> (i32, i32, i32) {
    %c0_i32 = arith.constant 0 : i32
    %c0_i32_0 = arith.constant 0 : i32
    %c0_i32_1 = arith.constant 0 : i32
    return %arg0, %c0_i32, %c0_i32_0 : i32, i32, i32
  }
  func.func @transform_1(%arg0: i32) -> (i32, i32) {
    %c0_i32 = arith.constant 0 : i32
    %c0_i32_0 = arith.constant 0 : i32
    %c0_i32_1 = arith.constant 0 : i32
    return %c0_i32, %c0_i32_0 : i32, i32
  }
  func.func @transform_2(%arg0: i32) -> (i32, i32) {
    %c0_i32 = arith.constant 0 : i32
    %c0_i32_0 = arith.constant 0 : i32
    %c0_i32_1 = arith.constant 0 : i32
    return %c0_i32, %c0_i32_0 : i32, i32
  }
  func.func @transform_3(%arg0: i32) -> (i32, i32, i32) {
    %c0_i32 = arith.constant 0 : i32
    %c0_i32_0 = arith.constant 0 : i32
    %c0_i32_1 = arith.constant 0 : i32
    return %arg0, %c0_i32, %c0_i32_0 : i32, i32, i32
  }
}

</mosaic_0001>

<bundles_post_ra>
// kernel: tpu_custom_call.1
= control target key start
LH: loop header
LB: loop body
LE: loop exit
PB: predicated region body
PF: predicated region fallthrough
CT: control target
= control target key end

     0   :  { %8 = vsyncpa [#allocation3], 0  ;;  %s966_s0 = inlined_call_operand.hbm [shape: f32[2,32,256], index: 0, kind: input, shape index: {}]   ;;  %s967_s1 = inlined_call_operand.vmem [shape: f32[32,8], index: 1, kind: input, shape index: {}]   ;;  %s968_s2 = inlined_call_operand.vmem [shape: f32[8,32], index: 2, kind: input, shape index: {}]   ;;  %s969_s3 = inlined_call_operand.hbm [shape: f32[2,32,256], index: 3, kind: output, shape index: {}]  }
   0x1   :  { %10 = vsyncpa [#allocation3 + $0x1], 0 }
   0x2   :  { %11 = vsyncpa [#allocation4], 0 }
   0x3   :  { %13 = vsyncpa [#allocation4 + $0x1], 0  ;;  %s753_s12 = smov 0   ;;  %s755_s13 = smov 0  }
   0x4   :  { %s757_s14 = smov 0   ;;  %s759_s15 = smov 0  }
   0x5 LB: > { %s774_s16 = sadd.s32 4294967295, %s722_s15   ;;  %s521_s17 = sadd.s32 4294967294, %s722_s15   ;;  %s722_s15 = sphi %s759_s15, %s982_s15   ;;  %s718_s14 = sphi %s757_s14, %s981_s14   ;;  %s714_s13 = sphi %s755_s13, %s980_s13   ;;  %s710_s12 = sphi %s753_s12, %s979_s12  }
   0x6   : > { %s778_s18 = sadd.s32 1, %s722_s15   ;;  %s26_s19 = sadd.s32 1, %s718_s14 }
   0x7   : > { %s23_s20 = ssub.s32 %s722_s15, %s778_s18  ;;  %p33_p0 = scmp.ne.s32.totalorder %s718_s14, %s714_s13 }
   0x8   : > { %p24_p1 = scmp.eq.s32.totalorder %s23_s20, 0  ;;  %p34_p2 = scmp.eq.s32.totalorder %s722_s15, 0 }
   0x9   : > { %p39_p3 = scmp.ne.s32.totalorder %s714_s13, %s710_s12  ;;  %p40_p4 = scmp.eq.s32.totalorder %s774_s16, 0 }
   0xa   : > { %s790_s21 = scalar_select %p24_p1, %s718_s14, %s26_s19  }
   0xb   : > { %p792_p5 = por %p34_p2, %p33_p0  ;;  %p796_p6 = por %p40_p4, %p39_p3 }
   0xc   : > { %p105_p7 = scmp.eq.s32.totalorder %s774_s16, 1  ;;  %p111_p8 = scmp.eq.s32.totalorder %s521_s17, 1 }
   0xd   : > { %p581_p10 = scmp.lt.s32.totalorder %s722_s15, 2  ;;  %s137_s26 = sand.u32 1, %s718_s14  }
   0xe   : > { %p803_p11 = por %p105_p7, %p33_p0  ;;  %p807_p12 = por %p111_p8, %p39_p3 }
   0xf   : > { %s538_s27 = sshll.u32 %s722_s15, 10  ;;  %s524_s28 = sshll.u32 %s137_s26, 6 }
  0x10   : > { %s973_s24 = scalar_select %p803_p11, 1, 0 }
  0x11   : > { %s974_s25 = scalar_select %p807_p12, 1, 0 }
  0x12   : > { %s816_s4 = scalar_lea.hbm %s966_s0, %s538_s27  ;;  %s141_s5 = scalar_lea.vmem [#allocation2], %s524_s28 }
  0x13   : > { %s148_s6 = sshll.u32 %s141_s5, 4  ;;  %p820_p13 = pnand %p581_p10, %p792_p5  ;;  %s824_s6 = int_to_ptr.vmem [resolvable:$true] %s148_s6 }
  0x14   : > { %s826_s8 = scalar_lea.sflag [#allocation3], %s137_s26  ;;  %s626_s9 = scalar_lea.hbm %s816_s4, 1024 }
  0x15   : > { %p627_p0 = scmp.ne.s32.totalorder %s816_s4, %s626_s9  ;;  %p628_p1 = pneg %p820_p13 }
  0x16   : > { %s631_s17 = scalar_lea.hbm %s966_s0, 2048  ;;  %p632_p4 = scmp.lt.u32.totalorder %s816_s4, %s966_s0 }
  0x17   : > { %p629_p2 = pnand %p628_p1, %p627_p0  ;;  %p633_p5 = scmp.lt.u32.totalorder %s631_s17, %s626_s9 }
  0x18   : > { %p635_p8 = scmp.lt.u32.totalorder %s626_s9, %s816_s4 }
  0x19   : > { %p630_p3 = pneg %p629_p2  ;;  %p634_p7 = por %p633_p5, %p632_p4 }
  0x1b   : > { %p636_p10 = por %p635_p8, %p634_p7 }
  0x1d   : > { %p637_p9 = pnand %p636_p10, %p630_p3 }
  0x1f   : > { %640 = shalt.err (!%p637_p9)
}
  0x20   : > { %s641_s22 = scalar_lea.vmem %s824_s6, 1024  ;;  %s724_s26 = smov [#allocation2]  }
  0x21   : > { %p642_p0 = scmp.ne.s32.totalorder %s824_s6, %s641_s22  ;;  %s646_s27 = sshll.u32 %s724_s26, 4  ;;  %s647_s27 = int_to_ptr.vmem [resolvable:$false] %s646_s27 }
  0x22   : > { %s648_s28 = scalar_lea.vmem %s647_s27, 2048  ;;  %p649_p11 = scmp.lt.s32.totalorder %s824_s6, %s647_s27 }
  0x23   : > { %p644_p2 = pnand %p642_p0, %p628_p1  ;;  %p650_p4 = scmp.lt.s32.totalorder %s648_s28, %s641_s22 }
  0x25   : > { %p645_p12 = pneg %p644_p2  ;;  %p651_p5 = por %p650_p4, %p649_p11 }
  0x27   : > { %p652_p7 = pnand %p651_p5, %p645_p12 }
  0x29   : > { %655 = shalt.err (!%p652_p7)
}
  0x2a   : > { %s725_s29 = smov 256   ;;  %s726_s30 = smov 16  }
  0x2b   : > { %576 = dma.hbm_to_vmem [thread:$0]  (!%p820_p13), %s816_s4, 1024, %s824_s6, %s826_s8, %s725_s29, %s725_s29, %s726_s30  }
  0x2c   : > { %p527_p9 = scmp.ge.s32.totalorder %s722_s15, 1  ;;  %p156_p1 = scmp.lt.s32.totalorder %s722_s15, 3 }
  0x2e   : > { %p157_p3 = pnand %p527_p9, %p156_p1 }
  0x2f   : > { %s857_s5 = sand.u32 (!%p157_p3), 1, %s714_s13  }
  0x30   : > { %160 = sbr.rel (%p157_p3) target bundleno = 804 (0x324), region = 32  ;;  %s528_s9 = sshll.u32 (!%p157_p3), %s857_s5, 6 }
  0x31   : > { %s163_s10 = scalar_lea.sflag (!%p157_p3), [#allocation3], %s857_s5  ;;  %s166_s11 = scalar_lea.vmem (!%p157_p3), [#allocation2], %s528_s9 }
  0x37   : > { %701 = dma.done.wait (%p796_p6), %s163_s10, 1024  }
  0x38   : > { %703 = vsyncadd (%p796_p6), %s163_s10, 4294966272  ;;  %v867_v0 = vld [vmem:[%s166_s11] sm:$0xff]  ;;  %v869_v1 = vld [vmem:[%s166_s11 + $0x8] sm:$0xff]  ;;  %v727_v15 = vmov 0.0|0.0   ;;  %vm728_vm0 = vmmov 0   ;;  %v729_v19 = vmov 0.0   ;;  %v217_v20 = vlaneseq }
  0x39   : > { %v871_v2 = vld [vmem:[%s166_s11 + $0x20] sm:$0xff]  ;;  %v197_v3 = vadd.f32 %v869_v1, %v867_v0  ;;  %v875_v4 = vld [vmem:[%s166_s11 + $0x28] sm:$0xff]  ;;  %v877_v5 = vld [vmem:[%s166_s11 + $0x10] sm:$0xff]  ;;  %563 = vmatprep.subr.bf16.mxu0 %v727_v15  ;;  %555 = vmatprep.mubr.msk.f32.mxu0 %vm728_vm0, %v729_v19  ;;  %vm228_vm1 = vcmask 130112   ;;  %vm235_vm2 = vcmask 195712   ;;  %vm242_vm3 = vcmask 261312  }
  0x3a   : > { %v879_v6 = vld [vmem:[%s166_s11 + $0x18] sm:$0xff]  ;;  %v203_v7 = vadd.f32 %v875_v4, %v871_v2  ;;  %v883_v8 = vld [vmem:[%s166_s11 + $0x30] sm:$0xff]  ;;  %v209_v12 = vld [vmem:[%s967_s1] sm:$0xff]  ;;  %558 = vmatprep.subr.mxu1 %v729_v19  ;;  %560 = vmatprep.mubr.msk.f32.mxu1 %vm728_vm0, %v729_v19  ;;  %v218_v21 = vand.u32 127, %v217_v20  ;;  %v220_v22 = vshrl.u32 %v217_v20, 7  ;;  %vm244_vm4 = vcmask 261120  }
  0x3b   : > { %v885_v9 = vld [vmem:[%s166_s11 + $0x38] sm:$0xff]  ;;  %198 = vadd.xlane.f32.xlu0 %v197_v3  ;;  %v200_v10 = vadd.f32 %v879_v6, %v877_v5  ;;  %v210_v13 = vld [vmem:[%s967_s1 + $0x8] sm:$0xff]  ;;  %v211_v16 = vld [vmem:[%s967_s1 + $0x10] sm:$0xff]  ;;  %vm319_vm5 = vcmask 64512   ;;  %s188_s27 = scalar_lea.vmem [#allocation5], %s528_s9  ;;  %s539_s29 = sshll.u32 %s774_s16, 10 }
  0x3c   : > { %204 = vadd.xlane.f32.xlu1 %v203_v7  ;;  %v206_v11 = vadd.f32 %v885_v9, %v883_v8  ;;  %v564_v14 = vpack.c.bf16 %v210_v13, %v209_v12  ;;  %v212_v17 = vld [vmem:[%s967_s1 + $0x18] sm:$0xff]  ;;  %v223_v23 = vadd.s32 4294967288, %v218_v21  ;;  %v230_v24 = vadd.s32 4294967280, %v218_v21  ;;  %v318_v41 = vld [vmem:[%s968_s2] sm:$0xff]  ;;  %s448_s28 = sshll.u32 %s188_s27, 4  ;;  %s920_s10 = scalar_lea.hbm %s969_s3, %s539_s29  ;;  %s915_s28 = int_to_ptr.vmem [resolvable:$true] %s448_s28 }
  0x3d   : > { %v567_v18 = vpack.c.bf16 %v212_v17, %v211_v16  ;;  %v237_v25 = vadd.s32 4294967272, %v218_v21  ;;  %v221_v27 = vsub.s32 %v218_v21, %v220_v22  ;;  %559 = vmatpush3.msra.mxu1 %v318_v41  ;;  %v401_v50 = vsub.s32 0, %v220_v22  ;;  %s435_s16 = scalar_lea.sflag [#allocation4], %s857_s5  ;;  %s656_s11 = scalar_lea.vmem %s915_s28, 1024 }
  0x3e   : > { %565 = vmatpush3.bf16.msra.mxu0 %v564_v14  ;;  %v226_v29 = vsub.s32 %v223_v23, %v220_v22  ;;  %v233_v30 = vsub.s32 %v230_v24, %v220_v22  ;;  %p657_p6 = scmp.ne.s32.totalorder %s915_s28, %s656_s11  ;;  %p976_p11 = scmp.ne.s32.totalorder %s973_s24, 0 }
  0x3f   : > { %201 = vadd.xlane.f32.xlu0 %v200_v10  ;;  %566 = vmatprep.subr.bf16.mxu0 %v727_v15  ;;  %v240_v31 = vsub.s32 %v237_v25, %v220_v22  ;;  %s730_s23 = smov [#allocation5]  }
  0x40   : > { %207 = vadd.xlane.f32.xlu1 %v206_v11  ;;  %p658_p12 = pnand %p657_p6, %p976_p11  ;;  %s660_s4 = sshll.u32 %s730_s23, 4  ;;  %s661_s4 = int_to_ptr.vmem [resolvable:$false] %s660_s4 }
  0x41   : > { %s662_s6 = scalar_lea.vmem %s661_s4, 2048  ;;  %p663_p8 = scmp.lt.s32.totalorder %s915_s28, %s661_s4 }
  0x42   : > { %568 = vmatpush3.bf16.msra.mxu0 %v567_v18  ;;  %p659_p13 = pneg %p658_p12  ;;  %p664_p10 = scmp.lt.s32.totalorder %s662_s6, %s656_s11 }
  0x44   : > { %p665_p0 = por %p664_p10, %p663_p8 }
  0x46   : > { %p666_p2 = pnand %p665_p0, %p659_p13 }
  0xc8   : > { %v199_v26 = vpop.xlane.xlu0 %198 }
  0xc9   : > { %v205_v28 = vpop.xlane.xlu1 %204  ;;  %v222_v33 = vrot.slane %v199_v26, %v221_v27 }
  0xca   : > { %v234_v36 = vrot.slane %v205_v28, %v233_v30 }
  0xcc   : > { %v202_v32 = vpop.xlane.xlu0 %201 }
  0xcd   : > { %v227_v34 = vrot.slane %v202_v32, %v226_v29  ;;  %v208_v35 = vpop.xlane.xlu1 %207 }
  0xce   : > { %v241_v37 = vrot.slane %v208_v35, %v240_v31 }
  0xcf   : > { %v229_v38 = vsel %vm228_vm1, %v227_v34, %v222_v33 }
  0xd0   : > { %v236_v39 = vsel %vm235_vm2, %v234_v36, %v229_v38 }
  0xd1   : > { %v243_v40 = vsel %vm242_vm3, %v241_v37, %v236_v39 }
  0xd2   : > { %556 = vmatmul.mubr.msk.f32.vlgmr.msra.gmra.mrb[0].mxu0 %vm244_vm4, %v243_v40 }
 0x1a5   : > { %v313_v42 = vpop.f32.mrb[0].mxu0 }
 0x1a6   : > { %v317_v43 = vmax.f32 %v313_v42, 0.0  ;;  %v557_v44 = vpop.f32.mrb[1].mxu0 }
 0x1a8   : > { %561 = vmatmul.mubr.msk.f32.vlgmr.msra.gmra.mrb[0].mxu1 %vm319_vm5, %v317_v43 }
 0x27b   : > { %v389_v45 = vpop.f32.mrb[0].mxu1 }
 0x27c   : > { %v532_v46 = vmul.f32 -1.442695, %v389_v45  ;;  %v562_v47 = vpop.f32.mrb[1].mxu1 }
 0x27e   : > { %622 = vpow2.f32 %v532_v46 }
 0x288   : > { %v623_v48 = vpop.eup %622 }
 0x289   : > { %v396_v49 = vadd.f32 1.0, %v623_v48 }
 0x28b   : > { %624 = vrcp.f32 %v396_v49 }
 0x295   : > { %v625_v51 = vpop.eup %624 }
 0x296   : > { %v402_v52 = vrot.slane %v625_v51, %v401_v50 }
 0x298   : > { %408 = vbcast.lane.b32.xlu1 %v402_v52, 264  ;;  %404 = vbcast.lane.b32.xlu0 %v402_v52, 256 }
 0x29c   : > { %412 = vbcast.lane.b32.xlu1 %v402_v52, 272 }
 0x2a0   : > { %416 = vbcast.lane.b32.xlu1 %v402_v52, 280 }
 0x30a   : > { %v409_v53 = vpop.permute.xlu1 %408  ;;  %v405_v54 = vpop.permute.xlu0 %404 }
 0x30b   : > { %v420_v55 = vmul.f32 %v409_v53, %v877_v5  ;;  %v421_v56 = vmul.f32 %v409_v53, %v879_v6  ;;  %v418_v57 = vmul.f32 %v405_v54, %v867_v0  ;;  %v419_v58 = vmul.f32 %v405_v54, %v869_v1 }
 0x30d   : > { %428 = vst [vmem:[%s188_s27 + $0x10] sm:$0xff] %v420_v55  ;;  %429 = vst [vmem:[%s188_s27 + $0x18] sm:$0xff] %v421_v56 }
 0x30e   : > { %426 = vst [vmem:[%s188_s27] sm:$0xff] %v418_v57  ;;  %427 = vst [vmem:[%s188_s27 + $0x8] sm:$0xff] %v419_v58  ;;  %v413_v59 = vpop.permute.xlu1 %412 }
 0x30f   : > { %v422_v60 = vmul.f32 %v413_v59, %v871_v2  ;;  %v423_v61 = vmul.f32 %v413_v59, %v875_v4 }
 0x311   : > { %430 = vst [vmem:[%s188_s27 + $0x20] sm:$0xff] %v422_v60  ;;  %431 = vst [vmem:[%s188_s27 + $0x28] sm:$0xff] %v423_v61 }
 0x312   : > { %v417_v62 = vpop.permute.xlu1 %416 }
 0x313   : > { %v424_v63 = vmul.f32 %v417_v62, %v883_v8  ;;  %v425_v0 = vmul.f32 %v417_v62, %v885_v9 }
 0x315   : > { %432 = vst [vmem:[%s188_s27 + $0x30] sm:$0xff] %v424_v63  ;;  %433 = vst [vmem:[%s188_s27 + $0x38] sm:$0xff] %v425_v0 }
 0x316   : > { %669 = shalt.err (!%p666_p2)
}
 0x317   : > { %s670_s7 = scalar_lea.hbm %s920_s10, 1024  ;;  %s674_s19 = scalar_lea.hbm %s969_s3, 2048 }
 0x318   : > { %p671_p4 = scmp.ne.s32.totalorder %s920_s10, %s670_s7  ;;  %p675_p9 = scmp.lt.u32.totalorder %s920_s10, %s969_s3 }
 0x319   : > { %p676_p1 = scmp.lt.u32.totalorder %s674_s19, %s670_s7  ;;  %p678_p6 = scmp.lt.u32.totalorder %s670_s7, %s920_s10 }
 0x31a   : > { %p672_p5 = pnand %p671_p4, %p976_p11 }
 0x31b   : > { %p677_p3 = por %p676_p1, %p675_p9 }
 0x31c   : > { %p673_p7 = pneg %p672_p5 }
 0x31d   : > { %p679_p12 = por %p678_p6, %p677_p3 }
 0x31f   : > { %p680_p13 = pnand %p679_p12, %p673_p7 }
 0x321   : > { %683 = shalt.err (!%p680_p13)
}
 0x322   : > { %s731_s26 = smov 256   ;;  %s732_s27 = smov 16  }
 0x323   : > { %571 = dma.vmem_to_hbm [thread:$0]  (%p976_p11), %s915_s28, 1024, %s920_s10, %s435_s16, %s731_s26, %s731_s26, %s732_s27  }
 0x324 PF: > { %s463_s29 = sand.u32 1, %s710_s12   ;;  %p977_p8 = scmp.ne.s32.totalorder %s974_s25, 0 }
 0x325   : > { %p978_p10 = scmp.ge.s32.totalorder %s722_s15, 2  ;;  %s464_s30 = scalar_lea.sflag [#allocation4], %s463_s29 }
 0x327   : > { %p578_p0 = pnand %p978_p10, %p977_p8 }
 0x329   : > { %705 = dma.done.wait (!%p578_p0), %s464_s30, 1024  }
 0x32a   : > { %707 = vsyncadd (!%p578_p0), %s464_s30, 4294966272  ;;  %p16_p2 = scmp.ge.s32.totalorder %s778_s18, 4   ;;  %s979_s12 = smov %s714_s13 }
 0x32b   : > { %s980_s13 = smov %s718_s14  ;;  %s981_s14 = smov %s790_s21 }
 0x32c   : > { %s982_s15 = smov %s778_s18  ;;  %18 = sbr.rel (!%p16_p2) target bundleno = 5 (0x5), region = 77 }
 0x333   :  { %469 = vsyncpa [#allocation3], 1 }
 0x334   :  { %471 = vsyncpa [#allocation3 + $0x1], 1 }
 0x335   :  { %472 = vsyncpa [#allocation4], 1 }
 0x336   :  { %474 = vsyncpa [#allocation4 + $0x1], 1 }

</bundles_post_ra>
